<compile_context>
chip_gen: v6e
topology: v6e:2x2x1
jax: 0.10.0
libtpu: 0.0.40
codegen_flags: <defaults>
</compile_context>

<pallas_src>
import functools
import math

import jax
import jax.numpy as jnp
from jax.experimental import pallas as pl
from jax.experimental.pallas import tpu as pltpu

_SQRT_2_OVER_PI = math.sqrt(2.0 / math.pi)   # python float -> no dtype promotion


def _gelu_new(x):
    # GPT-2 "new" gelu: 0.5 * x * (1 + tanh(sqrt(2/pi) * (x + 0.044715 x^3))).
    # Runs at the dtype of x (bf16 on v6e/v7x, f32 on v5e).
    return 0.5 * x * (1.0 + jnp.tanh(_SQRT_2_OVER_PI * (x + 0.044715 * x * x * x)))


def mlp_kernel(x_ref, w_in_ref, b_in_ref, w_out_ref, b_out_ref, o_ref, acc_ref,
               *, f32_gelu):
    # NOTE: the accumulator-in-scratch pattern below is only correct with the
    # d_mlp reduction axis as the LAST grid axis, marked "arbitrary".
    k = pl.program_id(1)
    tk = w_in_ref.shape[1]
    koff = pl.multiple_of(k * tk, tk)   # tk is a multiple of 128 (or == d_mlp)

    # First matmul for this d_mlp slice: bf16 MXU operands, f32 accumulation.
    pre = jnp.dot(x_ref[...], w_in_ref[...],
                  preferred_element_type=jnp.float32)
    pre = pre + b_in_ref[:, pl.ds(koff, tk)]          # b_in resident, sliced in-kernel
    if f32_gelu:
        post = _gelu_new(pre).astype(w_out_ref.dtype)  # v5e: no bf16 VPU/EUP path
    else:
        post = _gelu_new(pre.astype(jnp.bfloat16))     # v6e/v7x: bf16 gelu

    # Second matmul contribution, accumulated in the f32 VMEM scratch.
    contrib = jnp.dot(post, w_out_ref[...], preferred_element_type=jnp.float32)

    @pl.when(k == 0)
    def _():
        acc_ref[...] = contrib          # init with first contribution (no zeroing pass)

    @pl.when(k > 0)
    def _():
        acc_ref[...] += contrib

    @pl.when(k == pl.num_programs(1) - 1)
    def _():
        # b_out added exactly once, at the final reduction step.
        o_ref[...] = (acc_ref[...] + b_out_ref[...]).astype(o_ref.dtype)


def _round_up(x, m):
    return (x + m - 1) // m * m


def _tpu_generation():
    try:
        kind = jax.devices()[0].device_kind.lower()
    except Exception:
        return "unknown"
    if "7" in kind:
        return "v7x"
    if "v6" in kind or "6e" in kind:
        return "v6e"
    if "v5" in kind or "5e" in kind:
        return "v5e"
    return "unknown"


def _tile_vmem_bytes(tm, tk, d_model, d_mlp, out_itemsize, f32_gelu):
    """Rough working-set estimate for one grid step (double-buffered tiles)."""
    temp = 4 if f32_gelu else 2
    return (2 * tm * d_model * 2              # x tile (bf16), double-buffered
            + 2 * d_model * tk * 2            # W_in tile (bf16), double-buffered
            + 2 * tk * d_model * 2            # W_out tile (bf16), double-buffered
            + d_mlp * 4                       # b_in resident (f32)
            + 2 * d_model * 4                 # b_out
            + 2 * tm * d_model * out_itemsize  # out tile, double-buffered
            + tm * d_model * 4                # f32 accumulator scratch
            + 3 * tm * tk * temp)             # pre/gelu temporaries headroom


def _select_config(M, d_model, d_mlp, out_itemsize, tm_req, tk_req):
    gen = _tpu_generation()
    if gen == "v7x":
        tm_target, vmem_limit, f32_gelu = 512, 50 * 1024 * 1024, False
    elif gen == "v6e":
        tm_target, vmem_limit, f32_gelu = 1024, 104 * 1024 * 1024, False
    elif gen == "v5e":
        tm_target, vmem_limit, f32_gelu = 512, 104 * 1024 * 1024, True
    else:
        tm_target, vmem_limit, f32_gelu = 512, 64 * 1024 * 1024, True
    try:  # refine against actual VMEM capacity if queryable
        cap = int(pltpu.get_tpu_info().vmem_capacity_bytes)
        vmem_limit = min(vmem_limit, int(cap * 0.8))
    except Exception:
        pass
    budget = int(vmem_limit * 0.85)

    if tm_req is not None:
        tm_target = tm_req
    tm = min(tm_target, _round_up(M, 16))
    # v7x has 2 TensorCores: make sure the "parallel" token axis has >=2 tiles.
    if gen == "v7x" and M > 16 and _round_up(M, tm) // tm < 2:
        tm = _round_up((M + 1) // 2, 16)

    tk_candidates = [c for c in (1024, 768, 512, 384, 256, 128) if d_mlp % c == 0]
    if not tk_candidates:
        tk_candidates = [d_mlp]            # full-extent block is always legal
    if tk_req is not None:
        assert d_mlp % tk_req == 0, "tk must divide d_mlp"
        tk_candidates = [tk_req]

    while True:
        tk = None
        for c in tk_candidates:
            if _tile_vmem_bytes(tm, c, d_model, d_mlp, out_itemsize, f32_gelu) <= budget:
                tk = c
                break
        if tk is not None or tm <= 128:
            if tk is None:
                tk = tk_candidates[-1]
            return tm, tk, vmem_limit, f32_gelu
        tm = max(128, _round_up(tm // 2, 16))


def mlp_forward(x, w_in, b_in, w_out, b_out, *, tm=None, tk=None):
    """x: [batch, posn, d_model] -> [batch, posn, d_model].

    For best performance pass w_in / w_out already in bfloat16 (cast & cache
    them once outside the hot path); f32 weights are cast here as a fallback.
    """
    batch, posn, d_model = x.shape
    d_mlp = w_in.shape[1]
    out_dtype = x.dtype
    out_itemsize = jnp.dtype(out_dtype).itemsize

    M = batch * posn
    tm_eff, tk_eff, vmem_limit, f32_gelu = _select_config(
        M, d_model, d_mlp, out_itemsize, tm, tk)
    M_pad = _round_up(M, tm_eff)

    x2d = x.reshape(M, d_model).astype(jnp.bfloat16)
    if M_pad != M:
        x2d = jnp.pad(x2d, ((0, M_pad - M), (0, 0)))
    w_in_bf = w_in if w_in.dtype == jnp.bfloat16 else w_in.astype(jnp.bfloat16)
    w_out_bf = w_out if w_out.dtype == jnp.bfloat16 else w_out.astype(jnp.bfloat16)
    b_in2 = b_in.astype(jnp.float32).reshape(1, d_mlp)
    b_out2 = b_out.astype(jnp.float32).reshape(1, d_model)

    num_m = M_pad // tm_eff
    grid = (num_m, d_mlp // tk_eff)

    cost = pl.CostEstimate(
        flops=2 * 2 * M_pad * d_model * d_mlp,            # two matmuls
        transcendentals=M_pad * d_mlp,                    # tanh in gelu
        bytes_accessed=(x2d.size * 2                      # x read (bf16)
                        + num_m * (w_in_bf.size + w_out_bf.size) * 2  # weights re-streamed per M tile
                        + b_in2.size * 4 + b_out2.size * 4
                        + M_pad * d_model * out_itemsize),
    )

    kernel = functools.partial(mlp_kernel, f32_gelu=f32_gelu)

    out2d = pl.pallas_call(
        kernel,
        out_shape=jax.ShapeDtypeStruct((M_pad, d_model), out_dtype),
        grid_spec=pltpu.PrefetchScalarGridSpec(
            num_scalar_prefetch=0,
            grid=grid,
            in_specs=[
                pl.BlockSpec((tm_eff, d_model), lambda i, k: (i, 0)),   # x tile
                pl.BlockSpec((d_model, tk_eff), lambda i, k: (0, k)),   # W_in cols
                pl.BlockSpec((1, d_mlp), lambda i, k: (0, 0)),          # b_in (resident)
                pl.BlockSpec((tk_eff, d_model), lambda i, k: (k, 0)),   # W_out rows
                pl.BlockSpec((1, d_model), lambda i, k: (0, 0)),        # b_out
            ],
            out_specs=pl.BlockSpec((tm_eff, d_model), lambda i, k: (i, 0)),
            scratch_shapes=[pltpu.VMEM((tm_eff, d_model), jnp.float32)],
        ),
        compiler_params=pltpu.CompilerParams(
            dimension_semantics=("parallel", "arbitrary"),
            vmem_limit_bytes=vmem_limit,
        ),
        cost_estimate=cost,
    )(x2d, w_in_bf, b_in2, w_out_bf, b_out2)

    return out2d[:M].reshape(batch, posn, d_model)


def mlp_reference(x, w_in, b_in, w_out, b_out):
    pre = jnp.einsum("bpd,dm->bpm", x.astype(jnp.float32),
                     w_in.astype(jnp.float32)) + b_in
    post = _gelu_new(pre)
    return jnp.einsum("bpm,md->bpd", post, w_out.astype(jnp.float32)) + b_out


if __name__ == "__main__":
    # Small Config-consistent shapes.
    batch, posn = 2, 8
    d_model, d_mlp = 128, 256
    init_range = 0.02

    key = jax.random.PRNGKey(0)
    kx, kwin, kwout = jax.random.split(key, 3)

    x = jax.random.normal(kx, (batch, posn, d_model), dtype=jnp.float32)
    # nn.init.normal_(W, std=init_range); biases are zeros.
    w_in = init_range * jax.random.normal(kwin, (d_model, d_mlp), dtype=jnp.float32)
    w_out = init_range * jax.random.normal(kwout, (d_mlp, d_model), dtype=jnp.float32)
    b_in = jnp.zeros((d_mlp,), dtype=jnp.float32)
    b_out = jnp.zeros((d_model,), dtype=jnp.float32)

    # Pre-cast weights to bf16 ONCE (outside the hot path), per the perf review.
    w_in_bf = w_in.astype(jnp.bfloat16)
    w_out_bf = w_out.astype(jnp.bfloat16)

    ref = mlp_reference(x, w_in, b_in, w_out, b_out)

    # 1) Auto-selected tiles (single reduction step at these tiny shapes).
    out = jax.block_until_ready(mlp_forward(x, w_in_bf, b_in, w_out_bf, b_out))
    assert out.shape == (batch, posn, d_model)
    # bf16 MXU operands / bf16 gelu (f32 accumulation) -> loose tolerance vs f32 ref.
    assert jnp.allclose(out, ref, atol=2e-2, rtol=2e-2), "mismatch (auto tiles)"

    # 2) tk=128 -> two reduction steps over d_mlp, exercising the accumulator path.
    out2 = jax.block_until_ready(
        mlp_forward(x, w_in_bf, b_in, w_out_bf, b_out, tk=128))
    assert jnp.allclose(out2, ref, atol=2e-2, rtol=2e-2), "mismatch (tk=128)"

    print("KERNEL_OK")
</pallas_src>

<mosaic_0001>
module attributes {stable_mosaic.version = 11 : i64} {
  func.func @mlp_kernel(%arg0: i32, %arg1: i32, %arg2: memref<16x128xbf16, #tpu.memory_space<vmem>>, %arg3: memref<128x256xbf16, #tpu.memory_space<vmem>>, %arg4: memref<1x256xf32, #tpu.memory_space<vmem>>, %arg5: memref<256x128xbf16, #tpu.memory_space<vmem>>, %arg6: memref<1x128xf32, #tpu.memory_space<vmem>>, %arg7: memref<16x128xf32, #tpu.memory_space<vmem>>, %arg8: memref<16x128xf32, #tpu.memory_space<vmem>>) attributes {dimension_semantics = [#tpu.dimension_semantics<parallel>, #tpu.dimension_semantics<arbitrary>], iteration_bounds = array<i64: 1, 1>, scalar_prefetch = 0 : i64, scratch_operands = 1 : i64, tpu.core_type = #tpu.core_type<tc>, window_params = [{transform_indices = @transform_0, window_bounds = array<i64: 16, 128>}, {transform_indices = @transform_1, window_bounds = array<i64: 128, 256>}, {pipeline_mode = #tpu.pipeline_mode<synchronous>, transform_indices = @transform_2, window_bounds = array<i64: 1, 256>}, {transform_indices = @transform_3, window_bounds = array<i64: 256, 128>}, {pipeline_mode = #tpu.pipeline_mode<synchronous>, transform_indices = @transform_4, window_bounds = array<i64: 1, 128>}, {transform_indices = @transform_5, window_bounds = array<i64: 16, 128>}]} {
    %c256_i32 = arith.constant 256 : i32
    %0 = arith.muli %arg1, %c256_i32 : i32
    %1 = tpu.assume_multiple %0, 256 : i32
    %c0 = arith.constant 0 : index
    %c0_0 = arith.constant 0 : index
    %2 = vector.load %arg2[%c0, %c0_0] : memref<16x128xbf16, #tpu.memory_space<vmem>>, vector<16x128xbf16>
    %c0_1 = arith.constant 0 : index
    %c0_2 = arith.constant 0 : index
    %3 = vector.load %arg3[%c0_1, %c0_2] : memref<128x256xbf16, #tpu.memory_space<vmem>>, vector<128x256xbf16>
    %cst = arith.constant dense<0.000000e+00> : vector<16x256xf32>
    %4 = tpu.matmul %2, %3, %cst {dimension_numbers = #tpu.dot_dimension_numbers<[1], [0], [0], [1], [0, 0, 1, 1], [], []>} : vector<16x128xbf16>, vector<128x256xbf16>, vector<16x256xf32> -> vector<16x256xf32>
    %c0_3 = arith.constant 0 : index
    %5 = arith.index_cast %1 : i32 to index
    %6 = vector.load %arg4[%c0_3, %5] : memref<1x256xf32, #tpu.memory_space<vmem>>, vector<1x256xf32>
    %7 = vector.broadcast %6 : vector<1x256xf32> to vector<16x256xf32>
    %8 = arith.addf %4, %7 : vector<16x256xf32>
    %cst_4 = arith.constant 5.000000e-01 : f32
    %9 = vector.broadcast %cst_4 : f32 to vector<16x256xf32>
    %10 = arith.mulf %9, %8 : vector<16x256xf32>
    %cst_5 = arith.constant 4.471500e-02 : f32
    %11 = vector.broadcast %cst_5 : f32 to vector<16x256xf32>
    %12 = arith.mulf %11, %8 : vector<16x256xf32>
    %13 = arith.mulf %12, %8 : vector<16x256xf32>
    %14 = arith.mulf %13, %8 : vector<16x256xf32>
    %15 = arith.addf %8, %14 : vector<16x256xf32>
    %cst_6 = arith.constant 0.797884583 : f32
    %16 = vector.broadcast %cst_6 : f32 to vector<16x256xf32>
    %17 = arith.mulf %16, %15 : vector<16x256xf32>
    %18 = math.tanh %17 : vector<16x256xf32>
    %cst_7 = arith.constant 1.000000e+00 : f32
    %19 = vector.broadcast %cst_7 : f32 to vector<16x256xf32>
    %20 = arith.addf %19, %18 : vector<16x256xf32>
    %21 = arith.mulf %10, %20 : vector<16x256xf32>
    %22 = arith.truncf %21 : vector<16x256xf32> to vector<16x256xbf16>
    %c0_8 = arith.constant 0 : index
    %c0_9 = arith.constant 0 : index
    %23 = vector.load %arg5[%c0_8, %c0_9] : memref<256x128xbf16, #tpu.memory_space<vmem>>, vector<256x128xbf16>
    %cst_10 = arith.constant dense<0.000000e+00> : vector<16x128xf32>
    %24 = tpu.matmul %22, %23, %cst_10 {dimension_numbers = #tpu.dot_dimension_numbers<[1], [0], [0], [1], [0, 0, 1, 1], [], []>} : vector<16x256xbf16>, vector<256x128xbf16>, vector<16x128xf32> -> vector<16x128xf32>
    %c0_i32 = arith.constant 0 : i32
    %25 = arith.cmpi eq, %arg1, %c0_i32 : i32
    %26 = arith.extui %25 : i1 to i32
    %c0_i32_11 = arith.constant 0 : i32
    %27 = arith.cmpi ne, %26, %c0_i32_11 : i32
    scf.if %27 {
      %c0_16 = arith.constant 0 : index
      %c0_17 = arith.constant 0 : index
      %34 = vector.load %arg8[%c0_16, %c0_17] : memref<16x128xf32, #tpu.memory_space<vmem>>, vector<16x128xf32>
      tpu.vector_store %arg8[%c0_16, %c0_17], %24 {strides = array<i32>} : memref<16x128xf32, #tpu.memory_space<vmem>>, vector<16x128xf32>,
    } else {
    }
    %c0_i32_12 = arith.constant 0 : i32
    %28 = arith.cmpi sgt, %arg1, %c0_i32_12 : i32
    %29 = arith.extui %28 : i1 to i32
    %c0_i32_13 = arith.constant 0 : i32
    %30 = arith.cmpi ne, %29, %c0_i32_13 : i32
    scf.if %30 {
      %c0_16 = arith.constant 0 : index
      %c0_17 = arith.constant 0 : index
      %34 = vector.load %arg8[%c0_16, %c0_17] : memref<16x128xf32, #tpu.memory_space<vmem>>, vector<16x128xf32>
      %35 = arith.addf %34, %24 : vector<16x128xf32>
      %c0_18 = arith.constant 0 : index
      %c0_19 = arith.constant 0 : index
      %36 = vector.load %arg8[%c0_18, %c0_19] : memref<16x128xf32, #tpu.memory_space<vmem>>, vector<16x128xf32>
      tpu.vector_store %arg8[%c0_18, %c0_19], %35 {strides = array<i32>} : memref<16x128xf32, #tpu.memory_space<vmem>>, vector<16x128xf32>,
    } else {
    }
    %c0_i32_14 = arith.constant 0 : i32
    %31 = arith.cmpi eq, %arg1, %c0_i32_14 : i32
    %32 = arith.extui %31 : i1 to i32
    %c0_i32_15 = arith.constant 0 : i32
    %33 = arith.cmpi ne, %32, %c0_i32_15 : i32
    scf.if %33 {
      %c0_16 = arith.constant 0 : index
      %c0_17 = arith.constant 0 : index
      %34 = vector.load %arg8[%c0_16, %c0_17] : memref<16x128xf32, #tpu.memory_space<vmem>>, vector<16x128xf32>
      %c0_18 = arith.constant 0 : index
      %c0_19 = arith.constant 0 : index
      %35 = vector.load %arg6[%c0_18, %c0_19] : memref<1x128xf32, #tpu.memory_space<vmem>>, vector<1x128xf32>
      %36 = vector.broadcast %35 : vector<1x128xf32> to vector<16x128xf32>
      %37 = arith.addf %34, %36 : vector<16x128xf32>
      %c0_20 = arith.constant 0 : index
      %c0_21 = arith.constant 0 : index
      %38 = vector.load %arg7[%c0_20, %c0_21] : memref<16x128xf32, #tpu.memory_space<vmem>>, vector<16x128xf32>
      tpu.vector_store %arg7[%c0_20, %c0_21], %37 {strides = array<i32>} : memref<16x128xf32, #tpu.memory_space<vmem>>, vector<16x128xf32>,
    } else {
    }
    return
  }
  func.func @transform_0(%arg0: i32, %arg1: i32) -> (i32, i32) {
    %c0_i32 = arith.constant 0 : i32
    %c0_i32_0 = arith.constant 0 : i32
    return %arg0, %c0_i32 : i32, i32
  }
  func.func @transform_1(%arg0: i32, %arg1: i32) -> (i32, i32) {
    %c0_i32 = arith.constant 0 : i32
    %c0_i32_0 = arith.constant 0 : i32
    return %c0_i32, %arg1 : i32, i32
  }
  func.func @transform_2(%arg0: i32, %arg1: i32) -> (i32, i32) {
    %c0_i32 = arith.constant 0 : i32
    %c0_i32_0 = arith.constant 0 : i32
    %c0_i32_1 = arith.constant 0 : i32
    return %c0_i32, %c0_i32_0 : i32, i32
  }
  func.func @transform_3(%arg0: i32, %arg1: i32) -> (i32, i32) {
    %c0_i32 = arith.constant 0 : i32
    %c0_i32_0 = arith.constant 0 : i32
    return %arg1, %c0_i32 : i32, i32
  }
  func.func @transform_4(%arg0: i32, %arg1: i32) -> (i32, i32) {
    %c0_i32 = arith.constant 0 : i32
    %c0_i32_0 = arith.constant 0 : i32
    %c0_i32_1 = arith.constant 0 : i32
    return %c0_i32, %c0_i32_0 : i32, i32
  }
  func.func @transform_5(%arg0: i32, %arg1: i32) -> (i32, i32) {
    %c0_i32 = arith.constant 0 : i32
    %c0_i32_0 = arith.constant 0 : i32
    return %arg0, %c0_i32 : i32, i32
  }
}

</mosaic_0001>

<bundles_post_ra>
// kernel: tpu_custom_call.1
= control target key start
LH: loop header
LB: loop body
LE: loop exit
PB: predicated region body
PF: predicated region fallthrough
CT: control target
= control target key end

     0   :  { %10 = vsyncpa [#allocation4], 0  ;;  %s747_s0 = inlined_call_operand.hbm [shape: bf16[16,128], index: 0, kind: input, shape index: {}]   ;;  %s748_s1 = inlined_call_operand.hbm [shape: bf16[128,256], index: 1, kind: input, shape index: {}]   ;;  %s749_s2 = inlined_call_operand.vmem [shape: f32[1,256], index: 2, kind: input, shape index: {}]   ;;  %s750_s3 = inlined_call_operand.hbm [shape: bf16[256,128], index: 3, kind: input, shape index: {}]   ;;  %s751_s4 = inlined_call_operand.vmem [shape: f32[1,128], index: 4, kind: input, shape index: {}]   ;;  %s752_s5 = inlined_call_operand.hbm [shape: f32[16,128], index: 5, kind: output, shape index: {}]  }
   0x1   :  { %11 = vsyncpa [#allocation7], 0 }
   0x2   :  { %12 = vsyncpa [#allocation5], 0  ;;  %s684_s18 = smov [#allocation6]  }
   0x3   :  { %s30_s19 = sshll.u32 %s684_s18, 4  ;;  %s31_s19 = int_to_ptr.vmem [resolvable:$true] %s30_s19 }
   0x4   :  { %s606_s20 = scalar_lea.vmem %s31_s19, 2048  ;;  %p611_p1 = scmp.lt.s32.totalorder %s31_s19, %s31_s19 }
   0x5   :  { %p607_p0 = scmp.ne.s32.totalorder %s31_s19, %s606_s20  ;;  %p612_p2 = scmp.lt.s32.totalorder %s606_s20, %s606_s20 }
   0x7   :  { %p613_p3 = por %p612_p2, %p611_p1 }
   0x9   :  { %p614_p4 = pnand %p613_p3, %p607_p0 }
   0xb   :  { %617 = shalt.err (!%p614_p4)
}
   0xc   :  { %s685_s21 = smov 128   ;;  %s686_s22 = smov 8  }
   0xd   :  { %36 = dma.hbm_to_vmem [thread:$0]  %s748_s1, 2048, %s31_s19, [#allocation7], %s685_s21, %s685_s21, %s686_s22  }
   0xe   :  { %s687_s25 = smov [#allocation3]  }
   0xf   :  { %s18_s26 = sshll.u32 %s687_s25, 4  ;;  %s19_s26 = int_to_ptr.vmem [resolvable:$true] %s18_s26 }
  0x10   :  { %s626_s27 = scalar_lea.vmem %s19_s26, 128  ;;  %p631_p6 = scmp.lt.s32.totalorder %s19_s26, %s19_s26 }
  0x11   :  { %p627_p5 = scmp.ne.s32.totalorder %s19_s26, %s626_s27  ;;  %p632_p7 = scmp.lt.s32.totalorder %s626_s27, %s626_s27 }
  0x13   :  { %p633_p8 = por %p632_p7, %p631_p6 }
  0x15   :  { %p634_p9 = pnand %p633_p8, %p627_p5 }
  0x17   :  { %637 = shalt.err (!%p634_p9)
}
  0x18   :  { %s688_s28 = smov 64   ;;  %s689_s29 = smov 4  }
  0x19   :  { %24 = dma.hbm_to_vmem [thread:$0]  %s747_s0, 128, %s19_s26, [#allocation4], %s688_s28, %s688_s28, %s689_s29  }
  0x1a   :  { %s690_s7 = smov [#allocation8]  }
  0x1b   :  { %s44_s8 = sshll.u32 %s690_s7, 4  ;;  %s45_s8 = int_to_ptr.vmem [resolvable:$true] %s44_s8 }
  0x1c   :  { %s646_s1 = scalar_lea.vmem %s45_s8, 2048  ;;  %p651_p11 = scmp.lt.s32.totalorder %s45_s8, %s45_s8 }
  0x1d   :  { %p647_p10 = scmp.ne.s32.totalorder %s45_s8, %s646_s1  ;;  %p652_p12 = scmp.lt.s32.totalorder %s646_s1, %s646_s1 }
  0x1f   :  { %p653_p13 = por %p652_p12, %p651_p11 }
  0x21   :  { %p654_p0 = pnand %p653_p13, %p647_p10 }
  0x23   :  { %657 = shalt.err (!%p654_p0)
}
  0x24   :  { %50 = dma.hbm_to_vmem [thread:$0]  %s750_s3, 2048, %s45_s8, [#allocation7], %s688_s28, %s688_s28, %s689_s29  }
  0x25   :  { %678 = dma.done.wait [#allocation4], 128  }
  0x26   :  { %679 = vsyncadd [#allocation4], 4294967168 }
  0x27   :  { %680 = dma.done.wait [#allocation7], 4096  }
  0x28   :  { %681 = vsyncadd [#allocation7], 4294963200  ;;  %v691_v0 = vmov 0   ;;  %v549_v1 = vld [vmem:[#allocation6 + $0x74] ss:$8 sps:$4 sm:$0xff]   ;;  %v578_v22 = vld [vmem:[#allocation8 + $0x68] sm:$0xff]   ;;  %v87_v34 = vlaneseq }
  0x29   :  { %215 = vmatprep.mubr.bf16.mxu0 %v691_v0  ;;  %v551_v2 = vld [vmem:[#allocation6 + $0x70] ss:$8 sps:$4 sm:$0xff]   ;;  %183 = vmatprep.subr.bf16.mxu0 %v549_v1  ;;  %v552_v3 = vld [vmem:[#allocation6 + $0x64] ss:$8 sps:$4 sm:$0xff]   ;;  %v554_v4 = vld [vmem:[#allocation6 + $0x60] ss:$8 sps:$4 sm:$0xff]  }
  0x2a   :  { %184 = vmatpush1.bf16.msra.mxu0 %v551_v2  ;;  %v555_v5 = vld [vmem:[#allocation6 + $0x54] ss:$8 sps:$4 sm:$0xff]   ;;  %v557_v6 = vld [vmem:[#allocation6 + $0x50] ss:$8 sps:$4 sm:$0xff]   ;;  %v558_v7 = vld [vmem:[#allocation6 + $0x44] ss:$8 sps:$4 sm:$0xff]  }
  0x2b   :  { %185 = vmatprep.subr.bf16.mxu0 %v552_v3  ;;  %v560_v8 = vld [vmem:[#allocation6 + $0x40] ss:$8 sps:$4 sm:$0xff]   ;;  %v561_v9 = vld [vmem:[#allocation6 + $0x34] ss:$8 sps:$4 sm:$0xff]   ;;  %v563_v10 = vld [vmem:[#allocation6 + $0x30] ss:$8 sps:$4 sm:$0xff]  }
  0x2c   :  { %v564_v11 = vld [vmem:[#allocation6 + $0x24] ss:$8 sps:$4 sm:$0xff]   ;;  %v566_v12 = vld [vmem:[#allocation6 + $0x20] ss:$8 sps:$4 sm:$0xff]   ;;  %v567_v13 = vld [vmem:[#allocation6 + $0x14] ss:$8 sps:$4 sm:$0xff]  }
  0x2d   :  { %v569_v14 = vld [vmem:[#allocation6 + $0x10] ss:$8 sps:$4 sm:$0xff]   ;;  %v570_v15 = vld [vmem:[#allocation6 + $0x4] ss:$8 sps:$4 sm:$0xff]   ;;  %v572_v16 = vld [vmem:[#allocation6] ss:$8 sps:$4 sm:$0xff]  }
  0x2e   :  { %186 = vmatpush1.bf16.msra.mxu0 %v554_v4  ;;  %v573_v17 = vld [vmem:[#allocation3] sm:$0xff]   ;;  %v576_v20 = vld [vmem:[#allocation8 + $0x70] sm:$0xff]   ;;  %v579_v23 = vld [vmem:[#allocation8 + $0x28] sm:$0xff]   ;;  %v88_v35 = vshrl.u32 %v87_v34, 7  ;;  %s692_s12 = smov [#allocation9]  }
  0x2f   :  { %187 = vmatprep.subr.bf16.mxu0 %v555_v5  ;;  %v574_v18 = vld [vmem:[#allocation8 + $0x78] sm:$0xff]   ;;  %v577_v21 = vld [vmem:[#allocation8 + $0x30] sm:$0xff]   ;;  %v580_v24 = vld [vmem:[#allocation8 + $0x60] sm:$0xff]   ;;  %s470_s13 = sshll.u32 %s692_s12, 4  ;;  %s471_s13 = int_to_ptr.vmem [resolvable:$true] %s470_s13 }
  0x30   :  { %v575_v19 = vld [vmem:[#allocation8 + $0x38] sm:$0xff]   ;;  %518 = vmatprep.subr.bf16.mxu1 %v574_v18  ;;  %v581_v25 = vld [vmem:[#allocation8 + $0x20] sm:$0xff]   ;;  %v584_v28 = vld [vmem:[#allocation8 + $0x50] sm:$0xff]   ;;  %v89_v36 = vsub.s32 0, %v88_v35  ;;  %v93_v38 = vsub.s32 1, %v88_v35  ;;  %s658_s14 = scalar_lea.vmem %s471_s13, 256  ;;  %p663_p2 = scmp.lt.s32.totalorder %s471_s13, %s471_s13 }
  0x31   :  { %519 = vmatpush3.bf16.msra.mxu1 %v575_v19  ;;  %v582_v26 = vld [vmem:[#allocation8 + $0x58] sm:$0xff]   ;;  %v585_v29 = vld [vmem:[#allocation8 + $0x10] sm:$0xff]   ;;  %v586_v30 = vld [vmem:[#allocation8 + $0x48] sm:$0xff]   ;;  %p659_p1 = scmp.ne.s32.totalorder %s471_s13, %s658_s14  ;;  %p664_p3 = scmp.lt.s32.totalorder %s658_s14, %s658_s14 }
  0x32   :  { %188 = vmatpush1.bf16.msra.mxu0 %v557_v6  ;;  %520 = vmatprep.subr.bf16.mxu1 %v576_v20  ;;  %v583_v27 = vld [vmem:[#allocation8 + $0x18] sm:$0xff]   ;;  %v587_v31 = vld [vmem:[#allocation8 + $0x8] sm:$0xff]   ;;  %v588_v32 = vld [vmem:[#allocation8 + $0x40] sm:$0xff]  }
  0x33   :  { %189 = vmatprep.subr.bf16.mxu0 %v558_v7  ;;  %v589_v33 = vld [vmem:[#allocation8] sm:$0xff]   ;;  %v85_v37 = vld [vmem:[%s749_s2] sm:$0x3]  ;;  %p665_p4 = por %p664_p3, %p663_p2 }
  0x34   :  { %v90_v39 = vrot.slane %v85_v37, %v89_v36  ;;  %v94_v40 = vrot.slane %v85_v37, %v93_v38 }
  0x35   :  { %521 = vmatpush3.bf16.msra.mxu1 %v577_v21  ;;  %p666_p5 = pnand %p665_p4, %p659_p1 }
  0x36   :  { %190 = vmatpush1.bf16.msra.mxu0 %v560_v8  ;;  %522 = vmatprep.subr.bf16.mxu1 %v578_v22 }
  0x37   :  { %191 = vmatprep.subr.bf16.mxu0 %v561_v9 }
  0x39   :  { %523 = vmatpush3.bf16.msra.mxu1 %v579_v23 }
  0x3a   :  { %192 = vmatpush1.bf16.msra.mxu0 %v563_v10  ;;  %524 = vmatprep.subr.bf16.mxu1 %v580_v24 }
  0x3b   :  { %193 = vmatprep.subr.bf16.mxu0 %v564_v11 }
  0x3d   :  { %525 = vmatpush3.bf16.msra.mxu1 %v581_v25  ;;  %v517_v25 = vld [vmem:[%s751_s4] ss:$0 sm:$0xff] }
  0x3e   :  { %194 = vmatpush1.bf16.msra.mxu0 %v566_v12  ;;  %526 = vmatprep.subr.bf16.mxu1 %v582_v26 }
  0x3f   :  { %195 = vmatprep.subr.bf16.mxu0 %v567_v13 }
  0x41   :  { %527 = vmatpush3.bf16.msra.mxu1 %v583_v27 }
  0x42   :  { %196 = vmatpush1.bf16.msra.mxu0 %v569_v14  ;;  %528 = vmatprep.subr.bf16.mxu1 %v584_v28 }
  0x43   :  { %197 = vmatprep.subr.bf16.mxu0 %v570_v15 }
  0x45   :  { %529 = vmatpush3.bf16.msra.mxu1 %v585_v29 }
  0x46   :  { %198 = vmatpush1.bf16.msra.mxu0 %v572_v16  ;;  %530 = vmatprep.subr.bf16.mxu1 %v586_v30 }
  0x49   :  { %216 = vmatmul.mubr.bf16.vlgmr.msra.gmra.mxu0 %v573_v17  ;;  %531 = vmatpush3.bf16.msra.mxu1 %v587_v31 }
  0x4a   :  { %532 = vmatprep.subr.bf16.mxu1 %v588_v32 }
  0x4d   :  { %533 = vmatpush3.bf16.msra.mxu1 %v589_v33 }
 0x109   :  { %v217_v41 = vpop.f32.mrf.mxu0 }
 0x10a   :  { %v218_v42 = vadd.f32 %v217_v41, %v90_v39 }
 0x10b   :  { %v219_v43 = vpop.f32.mrf.mxu0 }
 0x10c   :  { %v230_v44 = vmul.f32 0.044715, %v218_v42  ;;  %v220_v45 = vadd.f32 %v219_v43, %v94_v40  ;;  %v226_v16 = vmul.f32 0.5, %v218_v42 }
 0x10d   :  { %v221_v46 = vpop.f32.mrf.mxu0 }
 0x10e   :  { %v234_v47 = vmul.f32 %v230_v44, %v218_v42  ;;  %v231_v48 = vmul.f32 0.044715, %v220_v45  ;;  %v222_v49 = vadd.f32 %v221_v46, %v90_v39  ;;  %v227_v13 = vmul.f32 0.5, %v220_v45 }
 0x10f   :  { %v223_v50 = vpop.f32.mrf.mxu0 }
 0x110   :  { %v238_v51 = vmul.f32 %v234_v47, %v218_v42  ;;  %v232_v52 = vmul.f32 0.044715, %v222_v49  ;;  %v224_v53 = vadd.f32 %v223_v50, %v94_v40  ;;  %v235_v54 = vmul.f32 %v231_v48, %v220_v45 }
 0x111   :  { %v228_v11 = vmul.f32 0.5, %v222_v49 }
 0x112   :  { %v236_v55 = vmul.f32 %v232_v52, %v222_v49  ;;  %v233_v56 = vmul.f32 0.044715, %v224_v53  ;;  %v239_v57 = vmul.f32 %v235_v54, %v220_v45  ;;  %v242_v58 = vadd.f32 %v238_v51, %v218_v42 }
 0x113   :  { %v229_v14 = vmul.f32 0.5, %v224_v53 }
 0x114   :  { %v240_v59 = vmul.f32 %v236_v55, %v222_v49  ;;  %v237_v60 = vmul.f32 %v233_v56, %v224_v53  ;;  %v243_v61 = vadd.f32 %v239_v57, %v220_v45  ;;  %v246_v62 = vmul.f32 0.7978846, %v242_v58 }
 0x116   :  { %v241_v63 = vmul.f32 %v237_v60, %v224_v53  ;;  %v247_v0 = vmul.f32 0.7978846, %v243_v61  ;;  %v244_v1 = vadd.f32 %v240_v59, %v222_v49 }
 0x118   :  { %v245_v2 = vadd.f32 %v241_v63, %v224_v53  ;;  %590 = vtanh.f32 %v247_v0  ;;  %v248_v3 = vmul.f32 0.7978846, %v244_v1 }
 0x119   :  { %592 = vtanh.f32 %v246_v62 }
 0x11a   :  { %v249_v4 = vmul.f32 0.7978846, %v245_v2  ;;  %594 = vtanh.f32 %v248_v3 }
 0x11c   :  { %596 = vtanh.f32 %v249_v4 }
 0x125   :  { %v591_v5 = vpop.eup %590 }
 0x126   :  { %v593_v6 = vpop.eup %592  ;;  %v255_v8 = vadd.f32 1.0, %v591_v5 }
 0x127   :  { %v595_v7 = vpop.eup %594  ;;  %v254_v12 = vadd.f32 1.0, %v593_v6 }
 0x128   :  { %v256_v9 = vadd.f32 1.0, %v595_v7  ;;  %v259_v18 = vmul.f32 %v255_v8, %v227_v13 }
 0x129   :  { %v597_v10 = vpop.eup %596  ;;  %v258_v20 = vmul.f32 %v254_v12, %v226_v16 }
 0x12a   :  { %v257_v15 = vadd.f32 1.0, %v597_v10  ;;  %v260_v17 = vmul.f32 %v256_v9, %v228_v11 }
 0x12c   :  { %v261_v19 = vmul.f32 %v257_v15, %v229_v14  ;;  %v262_v22 = vpack.c.bf16 %v260_v17, %v258_v20 }
 0x12e   :  { %v263_v21 = vpack.c.bf16 %v261_v19, %v259_v18 }
 0x130   :  { %424 = vmatprep.mubr.bf16.mxu1 %v263_v21 }
 0x131   :  { %425 = vmatmul.mubr.bf16.vlgmr.msra.gmra.mxu1 %v262_v22 }
 0x1f1   :  { %v534_v23 = vpop.f32.mrf.mxu1 }
 0x1f3   :  { %v535_v24 = vpop.f32.mrf.mxu1 }
 0x1f4   :  { %v536_v26 = vadd.f32 %v535_v24, %v534_v23 }
 0x1f5   :  { %v537_v27 = vpop.f32.mrf.mxu1 }
 0x1f6   :  { %v461_v28 = vadd.f32 %v536_v26, %v517_v25 }
 0x1f7   :  { %v538_v29 = vpop.f32.mrf.mxu1 }
 0x1f8   :  { %463 = vst [vmem:[#allocation9] sm:$0xff] %v461_v28  ;;  %v539_v30 = vadd.f32 %v538_v29, %v537_v27 }
 0x1fa   :  { %v462_v31 = vadd.f32 %v539_v30, %v517_v25 }
 0x1fc   :  { %464 = vst [vmem:[#allocation9 + $0x8] sm:$0xff] %v462_v31 }
 0x1fd   :  { %669 = shalt.err (!%p666_p5)
}
 0x1fe   :  { %476 = dma.vmem_to_hbm [thread:$0]  %s471_s13, 256, %s752_s5, [#allocation5], %s685_s21, %s685_s21, %s686_s22  }
 0x1ff   :  { %682 = dma.done.wait [#allocation5], 256  }
 0x200   :  { %683 = vsyncadd [#allocation5], 4294967040 }
 0x201   :  { %480 = vsyncpa [#allocation4], 1 }
 0x202   :  { %481 = vsyncpa [#allocation7], 1 }
 0x203   :  { %482 = vsyncpa [#allocation5], 1 }

</bundles_post_ra>
